<compile_context>
chip_gen: v5e
topology: v5e:2x2
jax: 0.10.0
libtpu: 0.0.40
codegen_flags: <defaults>
</compile_context>

<pallas_src>
import functools

import jax
import jax.numpy as jnp
from jax.experimental import pallas as pl
from jax.experimental.pallas import tpu as pltpu


def _cdiv(a, b):
    return -(-a // b)


def _padded_tile_bytes(h, w, itemsize):
    """VMEM footprint of one (h, w) slice: lanes pad to 128; sublanes pad to
    8 * (32 / bitwidth): 8 for 32-bit, 16 for bf16/f16, 32 for int8/fp8."""
    sub = max(8, 32 // max(1, itemsize))
    return (_cdiv(h, sub) * sub) * (_cdiv(w, 128) * 128) * itemsize


def _vmem_budget_bytes():
    """(tile_budget_bytes, vmem_limit_bytes), generation aware.

    v5e / v6e: 128 MiB physical VMEM -> large scoped budget.
    v7x: only 64 MiB per TensorCore -> conservative budget.
    Falls back to the conservative (v7x-safe) numbers if the query fails.
    """
    mib = 1024 * 1024
    phys = None
    try:
        info = pltpu.get_tpu_info()
        phys = (getattr(info, "vmem_capacity_bytes", None)
                or getattr(info, "vmem_size_bytes", None))
    except Exception:
        phys = None
    if phys is not None and phys >= 96 * mib:
        return 32 * mib, 64 * mib      # v5e / v6e
    return 24 * mib, 32 * mib          # v7x or unknown


def _wrap_cols(x, start, length, W):
    """Columns (start + t) % W of x's last axis, t in [0, length).

    Built from <=3 static contiguous lane slices + one lane concatenate, so
    the circular wrap never reads back from the output ref and never needs a
    runtime roll."""
    pos = start % W
    pieces = []
    remaining = length
    while remaining > 0:
        take = min(W - pos, remaining)
        pieces.append(x[..., pos:pos + take])
        remaining -= take
        pos = 0
    if len(pieces) == 1:
        return pieces[0]
    return jnp.concatenate(pieces, axis=-1)


def _circle_pad_kernel(x_ref, o_ref, *, ph, pw, H, W):
    """(BLOCK_NC, H, W) -> (BLOCK_NC, H_out, W_out).

    Reproduces, per slice:
      idx  = arange(-W//2, W//2)              (column gather, i.e. roll)
      up   = x[:ph, idx].flip(rows)
      down = x[-ph:, idx].flip(rows)
      mid  = cat([up, x, down], rows)
      out  = circular-pad mid by pw on left/right of W
    Composed into a single circular column gather per row region:
      center rows: out[ph+r, j]          = x[r,        (j - pw)         % W]
      top halo   : out[ph-1-r, j]        = x[r,        (j - pw - s) % W]   s = ceil(W/2)
      bot halo   : out[ph+H+ph-1-r, j]   = x[H-ph+r,   (j - pw - s) % W]
    """
    W_out = W + 2 * pw
    x = x_ref[...]                                        # (B, H, W)

    # ---- center rows: one full-width store --------------------------------
    center = _wrap_cols(x, -pw, W_out, W)                 # (B, H, W_out)
    o_ref[:, ph:ph + H, :] = center

    # ---- halo rows ---------------------------------------------------------
    if ph > 0:
        shift = -((-W) // 2)                              # == ceil(W/2)
        start = -(pw + shift)
        top = _wrap_cols(x[:, 0:ph, :], start, W_out, W)      # row r = x row r
        bot = _wrap_cols(x[:, H - ph:H, :], start, W_out, W)  # row r = x row H-ph+r
        # Row flip purely via destination addressing (no concat / reverse).
        for r in range(ph):
            o_ref[:, ph - 1 - r:ph - r, :] = top[:, r:r + 1, :]
            dst = ph + H + (ph - 1 - r)
            o_ref[:, dst:dst + 1, :] = bot[:, r:r + 1, :]


def circle_pad_pallas(x, padding=(1, 1)):
    ph, pw = padding
    N, C, H, W = x.shape
    if ph == 0 and pw == 0:
        return x
    assert 0 <= ph <= H, f"padding[0]={ph} must be <= H={H}"
    assert 0 <= pw <= W, f"padding[1]={pw} must be <= W={W}"

    H_out = H + 2 * ph
    W_out = W + 2 * pw
    NC = N * C
    itemsize = jnp.dtype(x.dtype).itemsize

    # Generation-aware block sizing.  Per-slice cost: 2x double-buffered input
    # + 2x double-buffered output + 1 output-sized allowance for the assembled
    # in-register rows.
    tile_budget, vmem_limit = _vmem_budget_bytes()
    per_slice = (2 * _padded_tile_bytes(H, W, itemsize)
                 + 3 * _padded_tile_bytes(H_out, W_out, itemsize))
    block_nc = int(max(1, min(NC, tile_budget // per_slice)))

    # Ensure >= 2 (even) grid steps so both v7x TensorCores get work; free on
    # v5e/v6e (grid is just a sequential loop there).
    if NC >= 2:
        steps = _cdiv(NC, block_nc)
        if steps < 2:
            steps = 2
        if steps % 2:
            steps += 1
        block_nc = max(1, _cdiv(NC, steps))
    grid = (_cdiv(NC, block_nc),)

    x2 = x.reshape(NC, H, W)                              # free on contiguous NCHW
    kernel = functools.partial(_circle_pad_kernel, ph=ph, pw=pw, H=H, W=W)
    bytes_accessed = NC * (H * W + H_out * W_out) * itemsize

    out = pl.pallas_call(
        kernel,
        out_shape=jax.ShapeDtypeStruct((NC, H_out, W_out), x.dtype),
        grid=grid,
        in_specs=[pl.BlockSpec((block_nc, H, W), lambda i: (i, 0, 0))],
        out_specs=pl.BlockSpec((block_nc, H_out, W_out), lambda i: (i, 0, 0)),
        compiler_params=pltpu.CompilerParams(
            dimension_semantics=("parallel",),
            vmem_limit_bytes=vmem_limit),
        cost_estimate=pl.CostEstimate(
            flops=0, transcendentals=0, bytes_accessed=bytes_accessed),
    )(x2)
    return out.reshape(N, C, H_out, W_out)


def circle_pad_ref(x, padding=(1, 1)):
    """Pure-JAX reference matching the PyTorch semantics exactly."""
    ph, pw = padding
    _, _, H, W = x.shape
    if ph == 0 and pw == 0:
        return x
    if ph == 0:
        mid = x
    else:
        idx = jnp.arange((-W) // 2, W // 2) % W
        up = x[:, :, :ph, :][..., idx][:, :, ::-1, :]
        down = x[:, :, H - ph:, :][..., idx][:, :, ::-1, :]
        mid = jnp.concatenate([up, x, down], axis=2)
    if pw > 0:
        mid = jnp.concatenate([mid[..., W - pw:], mid, mid[..., :pw]], axis=-1)
    return mid


class CirclePad:
    """Pad left/right-most to each other instead of zero padding (CIRCLE_PAD)."""

    def __init__(self, padding=(1, 1)):
        self.padding = padding

    def __call__(self, x):
        return circle_pad_pallas(x, self.padding)


if __name__ == "__main__":
    key = jax.random.PRNGKey(0)
    k1, k2 = jax.random.split(key)
    x = jax.random.normal(k1, (2, 4, 16, 16), dtype=jnp.float32)

    # Main case: padding=(1, 1)
    module = CirclePad(padding=(1, 1))
    out = jax.block_until_ready(module(x))
    assert out.shape == (2, 4, 18, 18), out.shape
    assert jnp.allclose(out, circle_pad_ref(x, (1, 1))), "mismatch (1,1)"

    # ph == 0 branch (pure circular width pad).
    out2 = jax.block_until_ready(circle_pad_pallas(x, (0, 2)))
    assert jnp.allclose(out2, circle_pad_ref(x, (0, 2))), "mismatch (0,2)"

    # pw == 0 branch.
    out3 = jax.block_until_ready(circle_pad_pallas(x, (1, 0)))
    assert jnp.allclose(out3, circle_pad_ref(x, (1, 0))), "mismatch (1,0)"

    # ph > 1 (exercises the destination-addressed row flip) and wider pw.
    out4 = jax.block_until_ready(circle_pad_pallas(x, (2, 3)))
    assert out4.shape == (2, 4, 20, 22), out4.shape
    assert jnp.allclose(out4, circle_pad_ref(x, (2, 3))), "mismatch (2,3)"

    # Odd W (checks the halo column offset ceil(W/2) against arange(-W//2, W//2)).
    x_odd = jax.random.normal(k2, (1, 2, 8, 9), dtype=jnp.float32)
    out5 = jax.block_until_ready(circle_pad_pallas(x_odd, (1, 1)))
    assert jnp.allclose(out5, circle_pad_ref(x_odd, (1, 1))), "mismatch odd W"

    print("KERNEL_OK")
</pallas_src>

<mosaic_0001>
module attributes {stable_mosaic.version = 11 : i64} {
  func.func @_circle_pad_kernel(%arg0: i32, %arg1: memref<4x16x16xf32, #tpu.memory_space<vmem>>, %arg2: memref<4x18x18xf32, #tpu.memory_space<vmem>>) attributes {dimension_semantics = [#tpu.dimension_semantics<parallel>], iteration_bounds = array<i64: 2>, scalar_prefetch = 0 : i64, scratch_operands = 0 : i64, tpu.core_type = #tpu.core_type<tc>, window_params = [{transform_indices = @transform_0, window_bounds = array<i64: 4, 16, 16>}, {transform_indices = @transform_1, window_bounds = array<i64: 4, 18, 18>}]} {
    %c0 = arith.constant 0 : index
    %c0_0 = arith.constant 0 : index
    %c0_1 = arith.constant 0 : index
    %0 = vector.load %arg1[%c0, %c0_0, %c0_1] : memref<4x16x16xf32, #tpu.memory_space<vmem>>, vector<4x16x16xf32>
    %1 = vector.extract_strided_slice %0 {offsets = [0, 0, 15], sizes = [4, 16, 1], strides = [1, 1, 1]} : vector<4x16x16xf32> to vector<4x16x1xf32>
    %2 = vector.extract_strided_slice %0 {offsets = [0, 0, 0], sizes = [4, 16, 1], strides = [1, 1, 1]} : vector<4x16x16xf32> to vector<4x16x1xf32>
    %3 = tpu.concatenate %1, %0, %2 in 2 : vector<4x16x1xf32>, vector<4x16x16xf32>, vector<4x16x1xf32> -> vector<4x16x18xf32>
    %c0_2 = arith.constant 0 : index
    %c1 = arith.constant 1 : index
    %c0_3 = arith.constant 0 : index
    %4 = vector.load %arg2[%c0_2, %c1, %c0_3] : memref<4x18x18xf32, #tpu.memory_space<vmem>>, vector<4x16x18xf32>
    tpu.vector_store %arg2[%c0_2, %c1, %c0_3], %3 {strides = array<i32>} : memref<4x18x18xf32, #tpu.memory_space<vmem>>, vector<4x16x18xf32>,
    %5 = vector.extract_strided_slice %0 {offsets = [0, 0, 0], sizes = [4, 1, 16], strides = [1, 1, 1]} : vector<4x16x16xf32> to vector<4x1x16xf32>
    %6 = vector.extract_strided_slice %5 {offsets = [0, 0, 7], sizes = [4, 1, 9], strides = [1, 1, 1]} : vector<4x1x16xf32> to vector<4x1x9xf32>
    %7 = vector.extract_strided_slice %5 {offsets = [0, 0, 0], sizes = [4, 1, 9], strides = [1, 1, 1]} : vector<4x1x16xf32> to vector<4x1x9xf32>
    %8 = tpu.concatenate %6, %7 in 2 : vector<4x1x9xf32>, vector<4x1x9xf32> -> vector<4x1x18xf32>
    %9 = vector.extract_strided_slice %0 {offsets = [0, 15, 0], sizes = [4, 1, 16], strides = [1, 1, 1]} : vector<4x16x16xf32> to vector<4x1x16xf32>
    %10 = vector.extract_strided_slice %9 {offsets = [0, 0, 7], sizes = [4, 1, 9], strides = [1, 1, 1]} : vector<4x1x16xf32> to vector<4x1x9xf32>
    %11 = vector.extract_strided_slice %9 {offsets = [0, 0, 0], sizes = [4, 1, 9], strides = [1, 1, 1]} : vector<4x1x16xf32> to vector<4x1x9xf32>
    %12 = tpu.concatenate %10, %11 in 2 : vector<4x1x9xf32>, vector<4x1x9xf32> -> vector<4x1x18xf32>
    %c0_4 = arith.constant 0 : index
    %c0_5 = arith.constant 0 : index
    %c0_6 = arith.constant 0 : index
    %13 = vector.load %arg2[%c0_4, %c0_5, %c0_6] : memref<4x18x18xf32, #tpu.memory_space<vmem>>, vector<4x1x18xf32>
    tpu.vector_store %arg2[%c0_4, %c0_5, %c0_6], %8 {strides = array<i32>} : memref<4x18x18xf32, #tpu.memory_space<vmem>>, vector<4x1x18xf32>,
    %c0_7 = arith.constant 0 : index
    %c17 = arith.constant 17 : index
    %c0_8 = arith.constant 0 : index
    %14 = vector.load %arg2[%c0_7, %c17, %c0_8] : memref<4x18x18xf32, #tpu.memory_space<vmem>>, vector<4x1x18xf32>
    tpu.vector_store %arg2[%c0_7, %c17, %c0_8], %12 {strides = array<i32>} : memref<4x18x18xf32, #tpu.memory_space<vmem>>, vector<4x1x18xf32>,
    return
  }
  func.func @transform_0(%arg0: i32) -> (i32, i32, i32) {
    %c0_i32 = arith.constant 0 : i32
    %c0_i32_0 = arith.constant 0 : i32
    %c0_i32_1 = arith.constant 0 : i32
    return %arg0, %c0_i32, %c0_i32_0 : i32, i32, i32
  }
  func.func @transform_1(%arg0: i32) -> (i32, i32, i32) {
    %c0_i32 = arith.constant 0 : i32
    %c0_i32_0 = arith.constant 0 : i32
    %c0_i32_1 = arith.constant 0 : i32
    return %arg0, %c0_i32, %c0_i32_0 : i32, i32, i32
  }
}

</mosaic_0001>

<bundles_post_ra>
// kernel: tpu_custom_call.1
= control target key start
LH: loop header
LB: loop body
LE: loop exit
PB: predicated region body
PF: predicated region fallthrough
CT: control target
= control target key end

     0   :  { %6 = vsyncpa [#allocation3], 0  ;;  %s690_s0 = inlined_call_operand.hbm [shape: f32[8,16,16], index: 0, kind: input, shape index: {}]   ;;  %s691_s1 = inlined_call_operand.vmem [shape: f32[8,18,18], index: 1, kind: output, shape index: {}]  }
   0x1   :  { %8 = vsyncpa [#allocation3 + $0x1], 0  ;;  %s541_s6 = smov 0   ;;  %s543_s7 = smov 0  }
   0x2   :  { %s545_s8 = smov 0   ;;  %s547_s9 = smov 0  }
   0x3 LB: > { %s395_s10 = sadd.s32 4294967295, %s522_s9   ;;  %s561_s11 = sadd.s32 1, %s522_s9   ;;  %s522_s9 = sphi %s547_s9, %s698_s9   ;;  %s518_s8 = sphi %s545_s8, %s697_s8   ;;  %s514_s7 = sphi %s543_s7, %s696_s7   ;;  %s510_s6 = sphi %s541_s6, %s695_s6  }
   0x4   : > { %s18_s12 = ssub.s32 %s522_s9, %s561_s11  ;;  %s21_s13 = sadd.s32 1, %s518_s8 }
   0x5   : > { %p19_p0 = scmp.eq.s32.totalorder %s18_s12, 0  ;;  %p28_p1 = scmp.ne.s32.totalorder %s518_s8, %s514_s7 }
   0x6   : > { %p29_p2 = scmp.eq.s32.totalorder %s522_s9, 0  ;;  %p34_p3 = scmp.ne.s32.totalorder %s514_s7, %s510_s6 }
   0x7   : > { %s571_s14 = scalar_select %p19_p0, %s518_s8, %s21_s13  }
   0x8   : > { %p573_p4 = por %p29_p2, %p28_p1  ;;  %p35_p5 = scmp.eq.s32.totalorder %s395_s10, 0 }
   0x9   : > { %p418_p6 = scmp.lt.s32.totalorder %s522_s9, 2  ;;  %s84_s17 = sand.u32 1, %s518_s8  }
   0xa   : > { %p580_p7 = por %p35_p5, %p34_p3  ;;  %s399_s18 = sshll.u32 %s84_s17, 6 }
   0xb   : > { %s410_s19 = sshll.u32 %s522_s9, 6  ;;  %s88_s23 = scalar_lea.vmem [#allocation2], %s399_s18 }
   0xc   : > { %s94_s22 = scalar_lea.hbm %s690_s0, %s410_s19  ;;  %s97_s24 = sshll.u32 %s88_s23, 4  ;;  %s98_s24 = int_to_ptr.vmem [resolvable:$true] %s97_s24 }
   0xd   : > { %s95_s25 = sshll.u32 %s94_s22, 4  ;;  %p591_p8 = pnand %p418_p6, %p573_p4  ;;  %s96_s25 = int_to_ptr.hbm [resolvable:$true] %s95_s25 }
   0xe   : > { %p403_p9 = scmp.ge.s32.totalorder %s522_s9, 1  ;;  %s85_s27 = scalar_lea.sflag [#allocation3], %s84_s17 }
   0xf   : > { %s458_s28 = sshra.s32 %s96_s25, 4  ;;  %p462_p11 = pneg %p591_p8  ;;  %s459_s28 = int_to_ptr.hbm [resolvable:$true] %s458_s28 }
  0x10   : > { %s460_s29 = scalar_lea.hbm %s459_s28, 64  ;;  %s465_s3 = scalar_lea.hbm %s690_s0, 128 }
  0x11   : > { %p461_p10 = scmp.ne.s32.totalorder %s459_s28, %s460_s29  ;;  %p466_p0 = scmp.lt.s32.totalorder %s459_s28, %s690_s0 }
  0x12   : > { %p467_p1 = scmp.lt.s32.totalorder %s465_s3, %s460_s29 }
  0x13   : > { %p463_p12 = pnand %p462_p11, %p461_p10 }
  0x14   : > { %p468_p2 = por %p467_p1, %p466_p0 }
  0x15   : > { %p464_p13 = pneg %p463_p12 }
  0x17   : > { %p469_p3 = pnand %p468_p2, %p464_p13 }
  0x19   : > { %472 = shalt.err (!%p469_p3)
}
  0x1a   : > { %s524_s6 = smov 128   ;;  %s525_s12 = smov 8  }
  0x1b   : > { %417 = dma.hbm_to_vmem [thread:$0]  (!%p591_p8), %s96_s25, 1024, %s98_s24, %s85_s27, %s524_s6, %s524_s6, %s525_s12  }
  0x1c   : > { %p105_p4 = scmp.lt.s32.totalorder %s522_s9, 3 }
  0x1e   : > { %p106_p5 = pnand %p403_p9, %p105_p4 }
  0x1f   : > { %s111_s13 = sand.u32 (!%p106_p5), 1, %s514_s7  }
  0x20   : > { %109 = sbr.rel (%p106_p5) target bundleno = 260 (0x104), region = 24  ;;  %s404_s15 = sshll.u32 (!%p106_p5), %s111_s13, 6 }
  0x21   : > { %s112_s17 = scalar_lea.sflag (!%p106_p5), [#allocation3], %s111_s13  ;;  %s115_s18 = scalar_lea.vmem (!%p106_p5), [#allocation2], %s404_s15 }
  0x25   : > { %505 = dma.done.wait (%p580_p7), %s112_s17, 1024  }
  0x26   : > { %507 = vsyncadd (%p580_p7), %s112_s17, 4294966272  ;;  %v146_v0 = vld [vmem:[%s115_s18 + $0x10] sm:$0xff]  ;;  %v144_v1 = vld [vmem:[%s115_s18] sm:$0xff]  ;;  %s526_s19 = smov 113   ;;  %s527_s20 = smov 1   ;;  %vm241_vm0 = vcmask 138240  }
  0x27   : > { %v148_v2 = vld [vmem:[%s115_s18 + $0x20] sm:$0xff]  ;;  %164 = vrot.lane.b32.xlu1 %v146_v0, %s526_s19  ;;  %160 = vrot.lane.b32.xlu0 %v144_v1, %s526_s19  ;;  %v147_v3 = vld [vmem:[%s115_s18 + $0x18] sm:$0xff]  ;;  %s528_s16 = smov 17   ;;  %s529_s21 = smov 121   ;;  %vm232_vm1 = vcmask 7168   ;;  %vm250_vm2 = vcmask 146432  }
  0x28   : > { %168 = vrot.lane.b32.xlu2 %v148_v2, %s526_s19  ;;  %v145_v4 = vld [vmem:[%s115_s18 + $0x8] sm:$0xff]  ;;  %v151_v6 = vld [vmem:[%s115_s18 + $0x38] sm:$0xff]  ;;  %v150_v7 = vld [vmem:[%s115_s18 + $0x30] sm:$0xff]  ;;  %s530_s22 = smov 9   ;;  %s405_s23 = sshll.u32 %s395_s10, 2  ;;  %vm283_vm3 = vcmask 72704  }
  0x29   : > { %v149_v5 = vld [vmem:[%s115_s18 + $0x28] sm:$0xff]  ;;  %p138_p6 = scmp.lt.s32.totalorder %s405_s23, 7  ;;  %vm316_vm4 = vcmask 139264   ;;  %vm321_vm5 = vcmask 146439  }
  0x2b   : > { %s700_s23 = smov (!%p138_p6, %s405_s23), 7 }
  0x2c   : > { %s411_s24 = smul.u32 24, %s700_s23 }
  0x2e   : > { %s619_s27 = scalar_lea.vmem %s691_s1, %s411_s24 }
  0x2f   : > { %166 = vrot.lane.b32.xlu1 %v147_v3, %s526_s19  ;;  %162 = vrot.lane.b32.xlu0 %v145_v4, %s526_s19 }
  0x30   : > { %170 = vrot.lane.b32.xlu2 %v149_v5, %s526_s19 }
  0x37   : > { %174 = vrot.lane.b32.xlu1 %v151_v6, %s526_s19  ;;  %172 = vrot.lane.b32.xlu0 %v150_v7, %s526_s19 }
  0x38   : > { %184 = vrot.lane.b32.xlu2 %v144_v1, %s527_s20 }
  0x3f   : > { %188 = vrot.lane.b32.xlu1 %v146_v0, %s527_s20  ;;  %186 = vrot.lane.b32.xlu0 %v145_v4, %s527_s20 }
  0x40   : > { %190 = vrot.lane.b32.xlu2 %v147_v3, %s527_s20 }
  0x47   : > { %194 = vrot.lane.b32.xlu1 %v149_v5, %s527_s20  ;;  %192 = vrot.lane.b32.xlu0 %v148_v2, %s527_s20 }
  0x48   : > { %196 = vrot.lane.b32.xlu2 %v150_v7, %s527_s20 }
  0x4f   : > { %208 = vrot.lane.b32.xlu1 %v144_v1, %s528_s16  ;;  %198 = vrot.lane.b32.xlu0 %v151_v6, %s527_s20 }
  0x50   : > { %210 = vrot.lane.b32.xlu2 %v145_v4, %s528_s16 }
  0x57   : > { %214 = vrot.lane.b32.xlu1 %v147_v3, %s528_s16  ;;  %212 = vrot.lane.b32.xlu0 %v146_v0, %s528_s16 }
  0x58   : > { %216 = vrot.lane.b32.xlu2 %v148_v2, %s528_s16 }
  0x5f   : > { %220 = vrot.lane.b32.xlu1 %v150_v7, %s528_s16  ;;  %218 = vrot.lane.b32.xlu0 %v149_v5, %s528_s16 }
  0x60   : > { %222 = vrot.lane.b32.xlu2 %v151_v6, %s528_s16 }
  0x67   : > { %261 = vrot.lane.b32.xlu1 %v146_v0, %s529_s21  ;;  %259 = vrot.lane.b32.xlu0 %v144_v1, %s529_s21 }
  0x68   : > { %271 = vrot.lane.b32.xlu2 %v144_v1, %s530_s22 }
  0x6f   : > { %300 = vrot.lane.b32.xlu1 %v145_v4, %s530_s22  ;;  %288 = vrot.lane.b32.xlu0 %v145_v4, %s529_s21 }
  0x70   : > { %273 = vrot.lane.b32.xlu2 %v146_v0, %s530_s22 }
  0x77   : > { %302 = vrot.lane.b32.xlu1 %v147_v3, %s530_s22  ;;  %290 = vrot.lane.b32.xlu0 %v147_v3, %s529_s21 }
  0x78   : > { %263 = vrot.lane.b32.xlu2 %v148_v2, %s529_s21 }
  0x7f   : > { %292 = vrot.lane.b32.xlu1 %v149_v5, %s529_s21  ;;  %275 = vrot.lane.b32.xlu0 %v148_v2, %s530_s22 }
  0x80   : > { %304 = vrot.lane.b32.xlu2 %v149_v5, %s530_s22 }
  0x82   : > { %v169_v8 = vpop.permute.xlu2 %168 }
  0x87   : > { %277 = vrot.lane.b32.xlu1 %v150_v7, %s530_s22  ;;  %265 = vrot.lane.b32.xlu0 %v150_v7, %s529_s21 }
  0x88   : > { %294 = vrot.lane.b32.xlu2 %v151_v6, %s529_s21 }
  0x8a   : > { %v171_v9 = vpop.permute.xlu2 %170 }
  0x8f   : > { %306 = vrot.lane.b32.xlu0 %v151_v6, %s530_s22 }
  0x92   : > { %v185_v10 = vpop.permute.xlu2 %184 }
  0x99   : > { %v165_v11 = vpop.permute.xlu1 %164  ;;  %v161_v12 = vpop.permute.xlu0 %160 }
  0x9a   : > { %v191_v13 = vpop.permute.xlu2 %190  ;;  %v233_v27 = vsel %vm232_vm1, %v161_v12, %v185_v10 }
  0xa1   : > { %v167_v14 = vpop.permute.xlu1 %166  ;;  %v163_v15 = vpop.permute.xlu0 %162 }
  0xa2   : > { %v197_v16 = vpop.permute.xlu2 %196  ;;  %v236_v32 = vsel %vm232_vm1, %v167_v14, %v191_v13 }
  0xa9   : > { %v175_v17 = vpop.permute.xlu1 %174  ;;  %v173_v18 = vpop.permute.xlu0 %172 }
  0xaa   : > { %v211_v19 = vpop.permute.xlu2 %210  ;;  %v239_v41 = vsel %vm232_vm1, %v173_v18, %v197_v16 }
  0xb1   : > { %v189_v20 = vpop.permute.xlu1 %188  ;;  %v187_v21 = vpop.permute.xlu0 %186 }
  0xb2   : > { %v234_v22 = vsel %vm232_vm1, %v163_v15, %v187_v21  ;;  %v217_v26 = vpop.permute.xlu2 %216  ;;  %v235_v33 = vsel %vm232_vm1, %v165_v11, %v189_v20 }
  0xb3   : > { %v243_v23 = vsel %vm241_vm0, %v234_v22, %v211_v19 }
  0xb4   : > { %252 = vst.msk [vmem:[%s619_s27 + $0x9] sm:$0xff] %vm250_vm2, %v243_v23 }
  0xb9   : > { %v195_v24 = vpop.permute.xlu1 %194  ;;  %v193_v25 = vpop.permute.xlu0 %192 }
  0xba   : > { %v223_v31 = vpop.permute.xlu2 %222  ;;  %v237_v34 = vsel %vm232_vm1, %v169_v8, %v193_v25  ;;  %v238_v42 = vsel %vm232_vm1, %v171_v9, %v195_v24 }
  0xbb   : > { %v246_v39 = vsel %vm241_vm0, %v237_v34, %v217_v26 }
  0xbc   : > { %255 = vst.msk [vmem:[%s619_s27 + $0x31] sm:$0xff] %vm250_vm2, %v246_v39 }
  0xc1   : > { %v209_v28 = vpop.permute.xlu1 %208  ;;  %v199_v29 = vpop.permute.xlu0 %198 }
  0xc2   : > { %v242_v30 = vsel %vm241_vm0, %v233_v27, %v209_v28  ;;  %v272_v40 = vpop.permute.xlu2 %271  ;;  %v240_v43 = vsel %vm232_vm1, %v175_v17, %v199_v29 }
  0xc3   : > { %251 = vst.msk [vmem:[%s619_s27 + $0x1] sm:$0xff] %vm250_vm2, %v242_v30  ;;  %v249_v48 = vsel %vm241_vm0, %v240_v43, %v223_v31 }
  0xc4   : > { %258 = vst.msk [vmem:[%s619_s27 + $0x51] sm:$0xff] %vm250_vm2, %v249_v48 }
  0xc9   : > { %v215_v35 = vpop.permute.xlu1 %214  ;;  %v213_v36 = vpop.permute.xlu0 %212 }
  0xca   : > { %v245_v37 = vsel %vm241_vm0, %v236_v32, %v215_v35  ;;  %v244_v38 = vsel %vm241_vm0, %v235_v33, %v213_v36  ;;  %v274_v49 = vpop.permute.xlu2 %273 }
  0xcb   : > { %254 = vst.msk [vmem:[%s619_s27 + $0x21] sm:$0xff] %vm250_vm2, %v245_v37 }
  0xcc   : > { %253 = vst.msk [vmem:[%s619_s27 + $0x19] sm:$0xff] %vm250_vm2, %v244_v38 }
  0xd1   : > { %v221_v44 = vpop.permute.xlu1 %220  ;;  %v219_v45 = vpop.permute.xlu0 %218 }
  0xd2   : > { %v248_v46 = vsel %vm241_vm0, %v239_v41, %v221_v44  ;;  %v247_v47 = vsel %vm241_vm0, %v238_v42, %v219_v45  ;;  %v264_v57 = vpop.permute.xlu2 %263 }
  0xd3   : > { %257 = vst.msk [vmem:[%s619_s27 + $0x49] sm:$0xff] %vm250_vm2, %v248_v46 }
  0xd4   : > { %256 = vst.msk [vmem:[%s619_s27 + $0x39] sm:$0xff] %vm250_vm2, %v247_v47 }
  0xd9   : > { %v262_v50 = vpop.permute.xlu1 %261  ;;  %v260_v51 = vpop.permute.xlu0 %259 }
  0xda   : > { %v284_v52 = vsel %vm283_vm3, %v260_v51, %v272_v40  ;;  %v285_v53 = vsel %vm283_vm3, %v262_v50, %v274_v49  ;;  %v305_v61 = vpop.permute.xlu2 %304 }
  0xdb   : > { %317 = vst.msk [vmem:[%s619_s27] sm:$0x1] %vm316_vm4, %v284_v52 }
  0xdc   : > { %318 = vst.msk [vmem:[%s619_s27 + $0x18] sm:$0x1] %vm316_vm4, %v285_v53 }
  0xe1   : > { %v301_v54 = vpop.permute.xlu1 %300  ;;  %v289_v55 = vpop.permute.xlu0 %288 }
  0xe2   : > { %v312_v56 = vsel %vm283_vm3, %v289_v55, %v301_v54  ;;  %v295_v5 = vpop.permute.xlu2 %294 }
  0xe3   : > { %322 = vst.msk [vmem:[%s619_s27 + $0xa] sm:$0x80] %vm321_vm5, %v312_v56 }
  0xe9   : > { %v303_v58 = vpop.permute.xlu1 %302  ;;  %v291_v59 = vpop.permute.xlu0 %290 }
  0xea   : > { %v313_v60 = vsel %vm283_vm3, %v291_v59, %v303_v58 }
  0xeb   : > { %323 = vst.msk [vmem:[%s619_s27 + $0x22] sm:$0x80] %vm321_vm5, %v313_v60 }
  0xf1   : > { %v293_v62 = vpop.permute.xlu1 %292  ;;  %v276_v63 = vpop.permute.xlu0 %275 }
  0xf2   : > { %v286_v0 = vsel %vm283_vm3, %v264_v57, %v276_v63  ;;  %v314_v1 = vsel %vm283_vm3, %v293_v62, %v305_v61 }
  0xf3   : > { %319 = vst.msk [vmem:[%s619_s27 + $0x30] sm:$0x1] %vm316_vm4, %v286_v0 }
  0xf4   : > { %324 = vst.msk [vmem:[%s619_s27 + $0x3a] sm:$0x80] %vm321_vm5, %v314_v1 }
  0xf9   : > { %v278_v2 = vpop.permute.xlu1 %277  ;;  %v266_v3 = vpop.permute.xlu0 %265 }
  0xfa   : > { %v287_v4 = vsel %vm283_vm3, %v266_v3, %v278_v2 }
  0xfb   : > { %320 = vst.msk [vmem:[%s619_s27 + $0x48] sm:$0x1] %vm316_vm4, %v287_v4 }
 0x101   : > { %v307_v6 = vpop.permute.xlu0 %306 }
 0x102   : > { %v315_v7 = vsel %vm283_vm3, %v295_v5, %v307_v6 }
 0x103   : > { %325 = vst.msk [vmem:[%s619_s27 + $0x52] sm:$0x80] %vm321_vm5, %v315_v7 }
 0x104 PF: > { %p11_p7 = scmp.ge.s32.totalorder %s561_s11, 4   ;;  %s695_s6 = smov %s514_s7 }
 0x105   : > { %s696_s7 = smov %s518_s8  ;;  %s697_s8 = smov %s571_s14 }
 0x106   : > { %s698_s9 = smov %s561_s11  ;;  %13 = sbr.rel (!%p11_p7) target bundleno = 3 (0x3), region = 64 }
 0x10b   :  { %350 = vsyncpa [#allocation3], 1 }
 0x10c   :  { %352 = vsyncpa [#allocation3 + $0x1], 1 }

</bundles_post_ra>
